<compile_context>
chip_gen: v5e
topology: v5e:2x2
jax: 0.10.0
libtpu: 0.0.40
codegen_flags: <defaults>
</compile_context>

<pallas_src>
import functools
import math

import jax
import jax.numpy as jnp
from jax.experimental import pallas as pl
from jax.experimental.pallas import tpu as pltpu


def _round_up(a, b):
    return ((a + b - 1) // b) * b


def _sublane(dtype):
    # f32 -> 8, bf16 -> 16, int8/fp8 -> 32 (sublane packing of the row tile).
    return max(8, 32 // jnp.dtype(dtype).itemsize)


# ----------------------------------------------------------------------------
# Fused FFN + residual + LayerNorm kernel.
# Grid = (row tiles [parallel], hidden chunks [arbitrary/reduction]).
# ----------------------------------------------------------------------------
def _ffn_kernel(x_ref, w1_ref, b1_ref, w2_ref, p_ref, o_ref, acc_ref,
                *, matmul_dtype, eps):
    k = pl.program_id(1)

    @pl.when(k == 0)
    def _():
        acc_ref[...] = jnp.zeros_like(acc_ref)

    x = x_ref[...]                                              # (TM, D) residual
    h = jnp.dot(x.astype(matmul_dtype), w1_ref[...],
                preferred_element_type=jnp.float32)             # (TM, TK), f32 acc
    h = jnp.maximum(h + b1_ref[...], 0.0)                       # bias + ReLU (f32)
    acc_ref[...] += jnp.dot(h.astype(matmul_dtype), w2_ref[...],
                            preferred_element_type=jnp.float32)  # (TM, D) partial

    @pl.when(k == pl.num_programs(1) - 1)
    def _():
        p = p_ref[...]                                          # (3, D): b2, gamma, beta
        y = acc_ref[...] + p[0:1, :] + x.astype(jnp.float32)    # bias + residual
        # Single-pass LayerNorm statistics: var = E[y^2] - mu^2.
        mu = jnp.mean(y, axis=-1, keepdims=True)
        ms = jnp.mean(y * y, axis=-1, keepdims=True)
        var = jnp.maximum(ms - mu * mu, 0.0)
        yn = (y - mu) * jax.lax.rsqrt(var + eps)
        o_ref[...] = (yn * p[1:2, :] + p[2:3, :]).astype(o_ref.dtype)


# ----------------------------------------------------------------------------
# pallas_call wrapper
# ----------------------------------------------------------------------------
def positionwise_feed_forward(x, params, *, block_rows=256, hidden_block=512,
                              matmul_dtype=jnp.bfloat16, eps=1e-6,
                              vmem_limit_bytes=None):
    orig_shape = x.shape
    d_in = orig_shape[-1]
    d_hid = params['w1'].shape[1]
    n = math.prod(orig_shape[:-1])

    xf = x.reshape(n, d_in)                 # no padding: ragged last block is OK

    # Row tile: MXU-sized, sublane-aligned for the I/O dtype, and small enough
    # that the "parallel" row axis has >= 2 tiles (both v7x TensorCores busy).
    sub = _sublane(x.dtype)
    tm = min(block_rows, _round_up(n, sub))
    if n > sub and pl.cdiv(n, tm) < 2:
        tm = _round_up(pl.cdiv(n, 2), sub)

    # Hidden chunk: must evenly divide d_hid and be a multiple of 128 (lane dim
    # of the w1 / b1 blocks); otherwise fall back to the full hidden width.
    if d_hid > hidden_block and hidden_block % 128 == 0 and d_hid % hidden_block == 0:
        tk = hidden_block
    else:
        tk = d_hid
    nk = d_hid // tk

    # Cast the big weight matrices once at the boundary (halves HBM traffic);
    # small per-feature params stay f32.  b2 / ln_g / ln_b stacked into (3, D).
    w1 = params['w1'].astype(matmul_dtype)                      # (D, H)
    w2 = params['w2'].astype(matmul_dtype)                      # (H, D)
    b1 = params['b1'].reshape(1, d_hid).astype(jnp.float32)     # (1, H)
    p3 = jnp.stack([params['b2'], params['ln_g'], params['ln_b']]
                   ).astype(jnp.float32)                        # (3, D)

    grid = (pl.cdiv(n, tm), nk)

    cost = pl.CostEstimate(
        flops=4 * n * d_in * d_hid + 8 * n * d_in,
        transcendentals=n,                                      # rsqrt per row
        bytes_accessed=(n * d_in * (xf.dtype.itemsize + jnp.dtype(x.dtype).itemsize)
                        + (w1.size + w2.size) * w1.dtype.itemsize
                        + (b1.size + p3.size) * 4))

    kernel = functools.partial(_ffn_kernel, matmul_dtype=matmul_dtype, eps=eps)
    out = pl.pallas_call(
        kernel,
        out_shape=jax.ShapeDtypeStruct((n, d_in), x.dtype),
        grid=grid,
        in_specs=[
            pl.BlockSpec((tm, d_in), lambda i, k: (i, 0)),      # x (resident over k)
            pl.BlockSpec((d_in, tk), lambda i, k: (0, k)),      # w1 chunk
            pl.BlockSpec((1, tk),   lambda i, k: (0, k)),       # b1 chunk
            pl.BlockSpec((tk, d_in), lambda i, k: (k, 0)),      # w2 chunk
            pl.BlockSpec((3, d_in), lambda i, k: (0, 0)),       # b2 / gamma / beta
        ],
        out_specs=pl.BlockSpec((tm, d_in), lambda i, k: (i, 0)),
        scratch_shapes=[pltpu.VMEM((tm, d_in), jnp.float32)],   # f32 accumulator
        compiler_params=pltpu.CompilerParams(
            dimension_semantics=("parallel", "arbitrary"),
            vmem_limit_bytes=vmem_limit_bytes),
        cost_estimate=cost,
    )(xf, w1, b1, w2, p3)

    return out.reshape(orig_shape)


# ----------------------------------------------------------------------------
# Pure-JAX reference (same bf16-matmul / f32-epilogue math) for correctness
# ----------------------------------------------------------------------------
def ffn_reference(x, params, *, matmul_dtype=jnp.bfloat16, eps=1e-6):
    xf = x.astype(jnp.float32)
    w1 = params['w1'].astype(matmul_dtype)
    w2 = params['w2'].astype(matmul_dtype)
    h = jnp.dot(xf.astype(matmul_dtype), w1, preferred_element_type=jnp.float32)
    h = jnp.maximum(h + params['b1'], 0.0)
    y = jnp.dot(h.astype(matmul_dtype), w2, preferred_element_type=jnp.float32)
    y = y + params['b2'] + xf
    mu = y.mean(-1, keepdims=True)
    var = ((y - mu) ** 2).mean(-1, keepdims=True)
    return ((y - mu) * jax.lax.rsqrt(var + eps)) * params['ln_g'] + params['ln_b']


# ----------------------------------------------------------------------------
# Deterministic parameter init (xavier-uniform weights, uniform biases)
# ----------------------------------------------------------------------------
def init_params(key, d_in, d_hid):
    k1, k2, k3, k4 = jax.random.split(key, 4)

    def xavier(k, shape):
        lim = (6.0 / (shape[0] + shape[1])) ** 0.5
        return jax.random.uniform(k, shape, jnp.float32, -lim, lim)

    return dict(
        w1=xavier(k1, (d_in, d_hid)),
        b1=jax.random.uniform(k2, (d_hid,), jnp.float32, -1.0, 1.0) / (d_in ** 0.5),
        w2=xavier(k3, (d_hid, d_in)),
        b2=jax.random.uniform(k4, (d_in,), jnp.float32, -1.0, 1.0) / (d_hid ** 0.5),
        ln_g=jnp.ones((d_in,), jnp.float32),
        ln_b=jnp.zeros((d_in,), jnp.float32),
    )


# ----------------------------------------------------------------------------
if __name__ == "__main__":
    d_in, d_hid = 32, 256
    batch, seq = 2, 7          # N = 14 -> two row tiles, ragged final block

    root = jax.random.PRNGKey(0)
    k_x, k_p = jax.random.split(root)
    x = jax.random.normal(k_x, (batch, seq, d_in), jnp.float32)
    params = init_params(k_p, d_in, d_hid)

    # hidden_block=128 at this toy d_hid exercises the hidden-chunked
    # accumulator path (2 chunks); at real sizes keep the 512 default.
    out = positionwise_feed_forward(x, params, hidden_block=128)
    out = jax.block_until_ready(out)

    ref = ffn_reference(x, params)
    assert out.shape == x.shape
    assert jnp.allclose(out, ref, atol=2e-3, rtol=2e-3), "Pallas FFN mismatch vs reference"

    print("KERNEL_OK")
</pallas_src>

<mosaic_0001>
module attributes {stable_mosaic.version = 11 : i64} {
  func.func @_ffn_kernel(%arg0: i32, %arg1: i32, %arg2: memref<8x32xf32, #tpu.memory_space<vmem>>, %arg3: memref<32x128xbf16, #tpu.memory_space<vmem>>, %arg4: memref<1x128xf32, #tpu.memory_space<vmem>>, %arg5: memref<128x32xbf16, #tpu.memory_space<vmem>>, %arg6: memref<3x32xf32, #tpu.memory_space<vmem>>, %arg7: memref<8x32xf32, #tpu.memory_space<vmem>>, %arg8: memref<8x32xf32, #tpu.memory_space<vmem>>) attributes {dimension_semantics = [#tpu.dimension_semantics<parallel>, #tpu.dimension_semantics<arbitrary>], iteration_bounds = array<i64: 2, 2>, scalar_prefetch = 0 : i64, scratch_operands = 1 : i64, tpu.core_type = #tpu.core_type<tc>, window_params = [{transform_indices = @transform_0, window_bounds = array<i64: 8, 32>}, {transform_indices = @transform_1, window_bounds = array<i64: 32, 128>}, {transform_indices = @transform_2, window_bounds = array<i64: 1, 128>}, {transform_indices = @transform_3, window_bounds = array<i64: 128, 32>}, {pipeline_mode = #tpu.pipeline_mode<synchronous>, transform_indices = @transform_4, window_bounds = array<i64: 3, 32>}, {transform_indices = @transform_5, window_bounds = array<i64: 8, 32>}]} {
    %c0_i32 = arith.constant 0 : i32
    %0 = arith.cmpi eq, %arg1, %c0_i32 : i32
    %1 = arith.extui %0 : i1 to i32
    %c0_i32_0 = arith.constant 0 : i32
    %2 = arith.cmpi ne, %1, %c0_i32_0 : i32
    scf.if %2 {
      %cst_15 = arith.constant 0.000000e+00 : f32
      %21 = vector.broadcast %cst_15 : f32 to vector<8x32xf32>
      %c0_16 = arith.constant 0 : index
      %c0_17 = arith.constant 0 : index
      %22 = vector.load %arg8[%c0_16, %c0_17] : memref<8x32xf32, #tpu.memory_space<vmem>>, vector<8x32xf32>
      tpu.vector_store %arg8[%c0_16, %c0_17], %21 {strides = array<i32>} : memref<8x32xf32, #tpu.memory_space<vmem>>, vector<8x32xf32>,
    } else {
    }
    %c0 = arith.constant 0 : index
    %c0_1 = arith.constant 0 : index
    %3 = vector.load %arg2[%c0, %c0_1] : memref<8x32xf32, #tpu.memory_space<vmem>>, vector<8x32xf32>
    %4 = arith.truncf %3 : vector<8x32xf32> to vector<8x32xbf16>
    %c0_2 = arith.constant 0 : index
    %c0_3 = arith.constant 0 : index
    %5 = vector.load %arg3[%c0_2, %c0_3] : memref<32x128xbf16, #tpu.memory_space<vmem>>, vector<32x128xbf16>
    %cst = arith.constant dense<0.000000e+00> : vector<8x128xf32>
    %6 = tpu.matmul %4, %5, %cst {dimension_numbers = #tpu.dot_dimension_numbers<[1], [0], [0], [1], [0, 0, 1, 1], [], []>} : vector<8x32xbf16>, vector<32x128xbf16>, vector<8x128xf32> -> vector<8x128xf32>
    %c0_4 = arith.constant 0 : index
    %c0_5 = arith.constant 0 : index
    %7 = vector.load %arg4[%c0_4, %c0_5] : memref<1x128xf32, #tpu.memory_space<vmem>>, vector<1x128xf32>
    %8 = vector.broadcast %7 : vector<1x128xf32> to vector<8x128xf32>
    %9 = arith.addf %6, %8 : vector<8x128xf32>
    %cst_6 = arith.constant 0.000000e+00 : f32
    %10 = vector.broadcast %cst_6 : f32 to vector<8x128xf32>
    %11 = arith.maximumf %9, %10 : vector<8x128xf32>
    %c0_7 = arith.constant 0 : index
    %c0_8 = arith.constant 0 : index
    %12 = vector.load %arg8[%c0_7, %c0_8] : memref<8x32xf32, #tpu.memory_space<vmem>>, vector<8x32xf32>
    %13 = arith.truncf %11 : vector<8x128xf32> to vector<8x128xbf16>
    %c0_9 = arith.constant 0 : index
    %c0_10 = arith.constant 0 : index
    %14 = vector.load %arg5[%c0_9, %c0_10] : memref<128x32xbf16, #tpu.memory_space<vmem>>, vector<128x32xbf16>
    %cst_11 = arith.constant dense<0.000000e+00> : vector<8x32xf32>
    %15 = tpu.matmul %13, %14, %cst_11 {dimension_numbers = #tpu.dot_dimension_numbers<[1], [0], [0], [1], [0, 0, 1, 1], [], []>} : vector<8x128xbf16>, vector<128x32xbf16>, vector<8x32xf32> -> vector<8x32xf32>
    %16 = arith.addf %12, %15 : vector<8x32xf32>
    %c0_12 = arith.constant 0 : index
    %c0_13 = arith.constant 0 : index
    %17 = vector.load %arg8[%c0_12, %c0_13] : memref<8x32xf32, #tpu.memory_space<vmem>>, vector<8x32xf32>
    tpu.vector_store %arg8[%c0_12, %c0_13], %16 {strides = array<i32>} : memref<8x32xf32, #tpu.memory_space<vmem>>, vector<8x32xf32>,
    %c1_i32 = arith.constant 1 : i32
    %18 = arith.cmpi eq, %arg1, %c1_i32 : i32
    %19 = arith.extui %18 : i1 to i32
    %c0_i32_14 = arith.constant 0 : i32
    %20 = arith.cmpi ne, %19, %c0_i32_14 : i32
    scf.if %20 {
      %c0_15 = arith.constant 0 : index
      %c0_16 = arith.constant 0 : index
      %21 = vector.load %arg6[%c0_15, %c0_16] : memref<3x32xf32, #tpu.memory_space<vmem>>, vector<3x32xf32>
      %c0_17 = arith.constant 0 : index
      %c0_18 = arith.constant 0 : index
      %22 = vector.load %arg8[%c0_17, %c0_18] : memref<8x32xf32, #tpu.memory_space<vmem>>, vector<8x32xf32>
      %23 = vector.extract_strided_slice %21 {offsets = [0, 0], sizes = [1, 32], strides = [1, 1]} : vector<3x32xf32> to vector<1x32xf32>
      %24 = vector.broadcast %23 : vector<1x32xf32> to vector<8x32xf32>
      %25 = arith.addf %22, %24 : vector<8x32xf32>
      %26 = arith.addf %25, %3 : vector<8x32xf32>
      %cst_19 = arith.constant dense<0.000000e+00> : vector<8xf32>
      %27 = vector.multi_reduction <add>, %26, %cst_19 [1] : vector<8x32xf32> to vector<8xf32>
      %28 = vector.shape_cast %27 : vector<8xf32> to vector<8x1xf32>
      %cst_20 = arith.constant 3.200000e+01 : f32
      %29 = vector.broadcast %cst_20 : f32 to vector<8x1xf32>
      %30 = arith.divf %28, %29 : vector<8x1xf32>
      %31 = arith.mulf %26, %26 : vector<8x32xf32>
      %cst_21 = arith.constant dense<0.000000e+00> : vector<8xf32>
      %32 = vector.multi_reduction <add>, %31, %cst_21 [1] : vector<8x32xf32> to vector<8xf32>
      %33 = vector.shape_cast %32 : vector<8xf32> to vector<8x1xf32>
      %cst_22 = arith.constant 3.200000e+01 : f32
      %34 = vector.broadcast %cst_22 : f32 to vector<8x1xf32>
      %35 = arith.divf %33, %34 : vector<8x1xf32>
      %36 = arith.mulf %30, %30 : vector<8x1xf32>
      %37 = arith.subf %35, %36 : vector<8x1xf32>
      %cst_23 = arith.constant 0.000000e+00 : f32
      %38 = vector.broadcast %cst_23 : f32 to vector<8x1xf32>
      %39 = arith.maximumf %37, %38 : vector<8x1xf32>
      %40 = vector.broadcast %30 : vector<8x1xf32> to vector<8x32xf32>
      %41 = arith.subf %26, %40 : vector<8x32xf32>
      %cst_24 = arith.constant 9.99999997E-7 : f32
      %42 = vector.broadcast %cst_24 : f32 to vector<8x1xf32>
      %43 = arith.addf %39, %42 : vector<8x1xf32>
      %44 = math.rsqrt %43 : vector<8x1xf32>
      %45 = vector.broadcast %44 : vector<8x1xf32> to vector<8x32xf32>
      %46 = arith.mulf %41, %45 : vector<8x32xf32>
      %47 = vector.extract_strided_slice %21 {offsets = [1, 0], sizes = [1, 32], strides = [1, 1]} : vector<3x32xf32> to vector<1x32xf32>
      %48 = vector.broadcast %47 : vector<1x32xf32> to vector<8x32xf32>
      %49 = arith.mulf %46, %48 : vector<8x32xf32>
      %50 = vector.extract_strided_slice %21 {offsets = [2, 0], sizes = [1, 32], strides = [1, 1]} : vector<3x32xf32> to vector<1x32xf32>
      %51 = vector.broadcast %50 : vector<1x32xf32> to vector<8x32xf32>
      %52 = arith.addf %49, %51 : vector<8x32xf32>
      %c0_25 = arith.constant 0 : index
      %c0_26 = arith.constant 0 : index
      %53 = vector.load %arg7[%c0_25, %c0_26] : memref<8x32xf32, #tpu.memory_space<vmem>>, vector<8x32xf32>
      tpu.vector_store %arg7[%c0_25, %c0_26], %52 {strides = array<i32>} : memref<8x32xf32, #tpu.memory_space<vmem>>, vector<8x32xf32>,
    } else {
    }
    return
  }
  func.func @transform_0(%arg0: i32, %arg1: i32) -> (i32, i32) {
    %c0_i32 = arith.constant 0 : i32
    %c0_i32_0 = arith.constant 0 : i32
    return %arg0, %c0_i32 : i32, i32
  }
  func.func @transform_1(%arg0: i32, %arg1: i32) -> (i32, i32) {
    %c0_i32 = arith.constant 0 : i32
    %c0_i32_0 = arith.constant 0 : i32
    return %c0_i32, %arg1 : i32, i32
  }
  func.func @transform_2(%arg0: i32, %arg1: i32) -> (i32, i32) {
    %c0_i32 = arith.constant 0 : i32
    %c0_i32_0 = arith.constant 0 : i32
    return %c0_i32, %arg1 : i32, i32
  }
  func.func @transform_3(%arg0: i32, %arg1: i32) -> (i32, i32) {
    %c0_i32 = arith.constant 0 : i32
    %c0_i32_0 = arith.constant 0 : i32
    return %arg1, %c0_i32 : i32, i32
  }
  func.func @transform_4(%arg0: i32, %arg1: i32) -> (i32, i32) {
    %c0_i32 = arith.constant 0 : i32
    %c0_i32_0 = arith.constant 0 : i32
    %c0_i32_1 = arith.constant 0 : i32
    return %c0_i32, %c0_i32_0 : i32, i32
  }
  func.func @transform_5(%arg0: i32, %arg1: i32) -> (i32, i32) {
    %c0_i32 = arith.constant 0 : i32
    %c0_i32_0 = arith.constant 0 : i32
    return %arg0, %c0_i32 : i32, i32
  }
}

</mosaic_0001>

<bundles_post_ra>
// kernel: tpu_custom_call.1
= control target key start
LH: loop header
LB: loop body
LE: loop exit
PB: predicated region body
PF: predicated region fallthrough
CT: control target
= control target key end

     0   :  { %s1152_s0 = inlined_call_operand.vmem [shape: f32[14,32], index: 0, kind: input, shape index: {}]   ;;  %s1153_s1 = inlined_call_operand.vmem [shape: bf16[32,256], index: 1, kind: input, shape index: {}]   ;;  %s1154_s2 = inlined_call_operand.vmem [shape: f32[1,256], index: 2, kind: input, shape index: {}]   ;;  %s1155_s3 = inlined_call_operand.vmem [shape: bf16[256,32], index: 3, kind: input, shape index: {}]   ;;  %s1156_s4 = inlined_call_operand.vmem [shape: f32[3,32], index: 4, kind: input, shape index: {}]   ;;  %s1157_s5 = inlined_call_operand.hbm [shape: f32[14,32], index: 5, kind: output, shape index: {}]  }
   0x1   :  { %1164 = sst [smem:[#allocation14_spill]] %s1153_s1 }
   0x2   :  { %10 = vsyncpa [#allocation5], 0 }
   0x3   :  { %12 = vsyncpa [#allocation5 + $0x1], 0  ;;  %s949_s18 = smov 0   ;;  %s951_s19 = smov 0  }
   0x4   :  { %s953_s20 = smov 0   ;;  %s955_s21 = smov 0  }
   0x5   :  { %s957_s22 = smov 0   ;;  %s959_s23 = smov 0  }
   0x6   :  { %s961_s24 = smov 0   ;;  %s963_s25 = smov 0  }
   0x7   :  { %s965_s26 = smov 0   ;;  %s967_s27 = smov 0  }
   0x8 LB: > { %1165 = sst [smem:[#allocation7_spill]] %s895_s22  ;;  %s642_s28 = sadd.s32 4294967295, %s915_s27   ;;  %s915_s27 = sphi %s967_s27, %s18_s27   ;;  %s911_s26 = sphi %s965_s26, %s1183_s26   ;;  %s907_s25 = sphi %s963_s25, %s1182_s25   ;;  %s903_s24 = sphi %s961_s24, %s1181_s24   ;;  %s899_s23 = sphi %s959_s23, %s1180_s23   ;;  %s895_s22 = sphi %s957_s22, %s1187_s22   ;;  %s891_s21 = sphi %s955_s21, %s1178_s21   ;;  %s887_s20 = sphi %s953_s20, %s1186_s20   ;;  %s883_s19 = sphi %s951_s19, %s1185_s19   ;;  %s879_s18 = sphi %s949_s18, %s1184_s18  }
   0x9   : > { %1166 = sst [smem:[#allocation8_spill]] %s907_s25  ;;  %s643_s29 = sadd.s32 4294967294, %s915_s27  }
   0xa   : > { %1167 = sst [smem:[#allocation9_spill]] %s911_s26  ;;  %s27_s30 = sadd.s32 1, %s907_s25 }
   0xb   : > { %s30_s6 = sadd.s32 1, %s911_s26  ;;  %p28_p0 = scmp.ge.s32.totalorder %s27_s30, 2 }
   0xc   : > { %s63_s7 = sadd.s32 1, %s895_s22  ;;  %p70_p1 = scmp.ne.s32.totalorder %s895_s22, %s891_s21 }
   0xd   : > { %p71_p2 = scmp.eq.s32.totalorder %s915_s27, 0  ;;  %s1189_s30 = smov (%p28_p0, %s27_s30), 0 }
   0xe   : > { %1168 = sst [smem:[#allocation10_spill]] %s1189_s30  ;;  %s1191_s6 = smov (!%p28_p0, %s30_s6), %s911_s26 }
   0xf   : > { %s60_s8 = ssub.s32 %s907_s25, %s1189_s30  ;;  %p1012_p3 = por %p71_p2, %p70_p1 }
  0x10   : > { %p32_p4 = scmp.ge.s32.totalorder %s1191_s6, 2  ;;  %p61_p5 = scmp.eq.s32.totalorder %s60_s8, 0 }
  0x11   : > { %s162_s10 = sadd.s32 1, %s887_s20  ;;  %p172_p6 = scmp.ne.s32.totalorder %s887_s20, %s883_s19 }
  0x12   : > { %s1193_s6 = smov (%p32_p4, %s1191_s6), 0  ;;  %p173_p7 = scmp.eq.s32.totalorder %s642_s28, 3 }
  0x13   : > { %1170 = sst [smem:[#allocation11_spill]] %s1193_s6  ;;  %s159_s12 = ssub.s32 %s911_s26, %s1193_s6 }
  0x14   : > { %s1022_s11 = scalar_select %p61_p5, %s895_s22, %s63_s7  }
  0x15   : > { %p160_p8 = scmp.eq.s32.totalorder %s159_s12, 0  ;;  %p178_p9 = scmp.ne.s32.totalorder %s883_s19, %s879_s18 }
  0x16   : > { %1171 = sst [smem:[#allocation12_spill]] %s1022_s11  ;;  %p1028_p10 = por %p173_p7, %p172_p6 }
  0x17   : > { %p179_p11 = scmp.eq.s32.totalorder %s643_s29, 3  ;;  %p645_p13 = scmp.ge.s32.totalorder %s915_s27, 4 }
  0x18   : > { %s1033_s14 = scalar_select %p160_p8, %s887_s20, %s162_s10  }
  0x19   : > { %p1035_p12 = por %p179_p11, %p178_p9  ;;  %198 = sbr.rel (%p645_p13) target bundleno = 44 (0x2c), region = 20 }
  0x1a   : > { %1173 = sst [smem:[#allocation13_spill]] %s1033_s14 }
  0x1e   : > { %208 = sbr.rel (!%p1012_p3) target bundleno = 44 (0x2c), region = 28  ;;  %s210_s16 = sand.u32 (%p1012_p3), 1, %s895_s22  }
  0x1f   : > { %s647_s17 = sshll.u32 (%p1012_p3), %s907_s25, 2  ;;  %s646_s28 = sshll.u32 (%p1012_p3), %s210_s16, 4 }
  0x20   : > { %s1175_s1 = sld [smem:[#allocation14_spill]] (%p1012_p3)  ;;  %s212_s10 = scalar_lea.vmem (%p1012_p3), [#allocation3], %s646_s28 }
  0x26   : > { %s214_s29 = scalar_lea.vmem %s1175_s1, %s647_s17 }
  0x27   : > { %v231_v0 = vld [vmem:[%s214_s29] sm:$0xf]  ;;  %v233_v1 = vld [vmem:[%s214_s29 + $0x8] sm:$0xf]  ;;  %v235_v2 = vld [vmem:[%s214_s29 + $0x10] sm:$0xf] }
  0x28   : > { %232 = vst [vmem:[%s212_s10] sm:$0xf] %v231_v0  ;;  %v237_v3 = vld [vmem:[%s214_s29 + $0x18] sm:$0xf] }
  0x29   : > { %234 = vst [vmem:[%s212_s10 + $0x4] sm:$0xf] %v233_v1 }
  0x2a   : > { %236 = vst [vmem:[%s212_s10 + $0x8] sm:$0xf] %v235_v2 }
  0x2b   : > { %238 = vst [vmem:[%s212_s10 + $0xc] sm:$0xf] %v237_v3 }
  0x2c PF: > { %p648_p0 = scmp.ge.s32.totalorder %s915_s27, 1  ;;  %p284_p1 = scmp.lt.s32.totalorder %s915_s27, 5 }
  0x2e   : > { %p285_p2 = pnand %p648_p0, %p284_p1 }
  0x2f   : > { %s291_s9 = sand.u32 (!%p285_p2), 1, %s891_s21   ;;  %s1160_s12 = sand.u32 (!%p285_p2), 1, %s883_s19  }
  0x30   : > { %288 = sbr.rel (%p285_p2) target bundleno = 518 (0x206), region = 77  ;;  %s649_s16 = sshll.u32 (!%p285_p2), %s291_s9, 4 }
  0x31   : > { %s1053_s17 = sshll.u32 (!%p285_p2), %s1160_s12, 3  ;;  %p330_p3 = scmp.lt.s32.totalorder (!%p285_p2), %s903_s24, 1 }
  0x32   : > { %p334_p4 = scmp.lt.s32.totalorder (!%p285_p2), %s899_s23, 1  ;;  %s652_s28 = sshll.u32 (!%p285_p2), %s899_s23, 4 }
  0x33   : > { %p338_p5 = scmp.lt.s32.totalorder (!%p285_p2), %s652_s28, 31  ;;  %s293_s22 = scalar_lea.vmem (!%p285_p2), [#allocation3], %s649_s16 }
  0x34   : > { %s329_s14 = scalar_lea.vmem (!%p285_p2), [#allocation4], %s1053_s17  ;;  %p654_p6 = scmp.ne.s32.totalorder (!%p285_p2), %s899_s23, 0 }
  0x35   : > { %s331_s7 = scalar_select %p330_p3, %s903_s24, 1 }
  0x36   : > { %s1060_s8 = scalar_select %p334_p4, %s899_s23, 1 }
  0x37   : > { %s651_s29 = sshll.u32 %s331_s7, 3  ;;  %s1195_s28 = smov (!%p338_p5, %s652_s28), 31 }
  0x38   : > { %s333_s6 = scalar_lea.vmem %s1152_s0, %s651_s29  ;;  %s336_s9 = scalar_lea.vmem %s1154_s2, %s1060_s8 }
  0x39   : > { %s653_s12 = sshll.u32 %s1195_s28, 2  ;;  %347 = sbr.rel (%p654_p6) target bundleno = 64 (0x40), region = 85 }
  0x3a   : > { %s1072_s11 = scalar_lea.vmem %s1155_s3, %s653_s12 }
  0x3e   : > { %vm348_vm0 = vcmask 261120   ;;  %v917_v4 = vmov 0.0  }
  0x3f   : > { %349 = vst.msk [vmem:[#allocation2] sm:$0xff] %vm348_vm0, %v917_v4 }
  0x40 PF: > { %v702_v5 = vld [vmem:[%s293_s22 + $0x8] sm:$0xff]  ;;  %v710_v6 = vld [vmem:[%s1072_s11 + $0x38] sm:$0xff]  ;;  %vm372_vm1 = vcmask 261120   ;;  %v708_v11 = vld [vmem:[%s1072_s11 + $0x28] sm:$0xff]  ;;  %p696_p7 = scmp.ne.s32.totalorder %s899_s23, 1 }
  0x41   : > { %382 = vmatpush.bf16.msra.mxu0 %v702_v5  ;;  %v701_v7 = vld [vmem:[%s293_s22] sm:$0xff]  ;;  %v350_v8 = vld [vmem:[%s333_s6] sm:$0xff]  ;;  %456 = vmatpush.bf16.msra.mxu1 %v710_v6  ;;  %v709_v9 = vld [vmem:[%s1072_s11 + $0x30] sm:$0xff] }
  0x42   : > { %v351_v10 = vpack.c.bf16 %v350_v8, %v350_v8  ;;  %v707_v12 = vld [vmem:[%s1072_s11 + $0x20] sm:$0xff]  ;;  %v706_v13 = vld [vmem:[%s1072_s11 + $0x18] sm:$0xff]  ;;  %v705_v14 = vld [vmem:[%s1072_s11 + $0x10] sm:$0xff] }
  0x43   : > { %v704_v15 = vld [vmem:[%s1072_s11 + $0x8] sm:$0xff]  ;;  %v703_v16 = vld [vmem:[%s1072_s11] sm:$0xff] }
  0x44   : > { %v800_v17 = vld [vmem:[%s336_s9] ss:$0 sm:$0xff] }
  0x45   : > { %383 = vmatpush.bf16.msra.mxu0 %v701_v7  ;;  %457 = vmatpush.bf16.msra.mxu1 %v709_v9 }
  0x46   : > { %v390_v23 = vld [vmem:[#allocation2] sm:$0xff] }
  0x48   : > { %663 = vmatmul.msk.bf16.vlgmr.msra.gmra.mxu0 %vm372_vm1, %v351_v10 }
  0x49   : > { %458 = vmatpush.bf16.msra.mxu1 %v708_v11 }
  0x4d   : > { %459 = vmatpush.bf16.msra.mxu1 %v707_v12 }
  0x51   : > { %460 = vmatpush.bf16.msra.mxu1 %v706_v13 }
  0x55   : > { %461 = vmatpush.bf16.msra.mxu1 %v705_v14 }
  0x59   : > { %462 = vmatpush.bf16.msra.mxu1 %v704_v15 }
  0x5d   : > { %463 = vmatpush.bf16.msra.mxu1 %v703_v16 }
  0xc5   : > { %v385_v18 = vpop.f32.mrf.mxu0 }
  0xc6   : > { %v386_v19 = vadd.f32 %v800_v17, %v385_v18 }
  0xc8   : > { %v389_v20 = vmax.f32 %v386_v19, 0.0 }
  0xca   : > { %v391_v21 = vpack.c.bf16 %v389_v20, %v389_v20 }
  0xcc   : > { %464 = vmatmul.bf16.vlgmr.msra.gmra.mxu1 %v391_v21 }
  0xcd   : > { %v387_v22 = vpop.f32.mrf.mxu0 }
 0x149   : > { %v465_v24 = vpop.f32.mrf.mxu1 }
 0x14a   : > { %v469_v25 = vadd.f32 %v465_v24, %v390_v23 }
 0x14c   : > { %470 = vst.msk [vmem:[#allocation2] sm:$0xff] %vm372_vm1, %v469_v25 }
 0x14d   : > { %474 = sbr.rel (%p696_p7) target bundleno = 503 (0x1f7), region = 89 }
 0x151   : > { %v467_v26 = vpop.f32.mrf.mxu1 }
 0x152   : > { %v475_v27 = vld [vmem:[%s1156_s4] sm:$0x7]  ;;  %v918_v35 = vmov 32.0  }
 0x153   : > { %v476_v28 = vld [vmem:[#allocation2] sm:$0xff]  ;;  %v477_v29 = vperm.slane %v475_v27, 0  ;;  %801 = vrcp.f32 %v918_v35  ;;  %v512_v56 = vperm.slane %v475_v27, 1  ;;  %v514_v59 = vperm.slane %v475_v27, 2 }
 0x155   : > { %v478_v30 = vadd.f32 %v477_v29, %v476_v28 }
 0x157   : > { %v479_v31 = vadd.f32 %v478_v30, %v350_v8 }
 0x159   : > { %v480_v32 = vsel %vm372_vm1, %v479_v31, 0.0  ;;  %v491_v33 = vmul.f32 %v479_v31, %v479_v31  ;;  %v802_v36 = vpop.eup %801 }
 0x15a   : > { %481 = vadd.xlane.f32.xlu0 %v480_v32  ;;  %v484_v37 = vmul.f32 32.0, %v802_v36  ;;  %vm488_vm2 = vweird.f32 %v802_v36 }
 0x15b   : > { %v492_v34 = vsel %vm372_vm1, %v491_v33, 0.0 }
 0x15c   : > { %v485_v38 = vsub.f32 1.0, %v484_v37 }
 0x15e   : > { %v486_v39 = vmul.f32 %v802_v36, %v485_v38 }
 0x160   : > { %v487_v40 = vadd.f32 %v802_v36, %v486_v39 }
 0x162   : > { %493 = vadd.xlane.f32.xlu0 %v492_v34  ;;  %v489_v42 = vsel %vm488_vm2, %v802_v36, %v487_v40 }
 0x1cd   : > { %v482_v41 = vpop.xlane.xlu0 %481 }
 0x1ce   : > { %v490_v43 = vmul.f32 %v489_v42, %v482_v41 }
 0x1d0   : > { %v496_v45 = vmul.f32 %v490_v43, %v490_v43  ;;  %v499_v57 = vsub.f32 %v479_v31, %v490_v43 }
 0x1d5   : > { %v494_v44 = vpop.xlane.xlu0 %493 }
 0x1d6   : > { %v495_v46 = vmul.f32 %v494_v44, %v489_v42 }
 0x1d8   : > { %v497_v47 = vsub.f32 %v495_v46, %v496_v45 }
 0x1da   : > { %v498_v48 = vmax.f32 %v497_v47, 0.0 }
 0x1dc   : > { %v500_v49 = vadd.f32 1e-06, %v498_v48 }
 0x1de   : > { %803 = vrsqrt.f32 %v500_v49  ;;  %vm507_vm4 = vweird.f32 %v500_v49 }
 0x1e4   : > { %v804_v50 = vpop.eup %803 }
 0x1e5   : > { %v502_v51 = vmul.f32 %v804_v50, %v500_v49  ;;  %vm508_vm3 = vweird.f32 %v804_v50 }
 0x1e6   : > { %vm509_vm5 = vmor %vm507_vm4, %vm508_vm3 }
 0x1e7   : > { %v503_v52 = vmul.f32 %v804_v50, %v502_v51 }
 0x1e9   : > { %v504_v53 = vmul.f32 0.5, %v503_v52 }
 0x1eb   : > { %v505_v54 = vsub.f32 1.5, %v504_v53 }
 0x1ed   : > { %v506_v55 = vmul.f32 %v804_v50, %v505_v54 }
 0x1ef   : > { %v510_v58 = vsel %vm509_vm5, %v804_v50, %v506_v55 }
 0x1f0   : > { %v511_v60 = vmul.f32 %v510_v58, %v499_v57 }
 0x1f2   : > { %v513_v61 = vmul.f32 %v512_v56, %v511_v60 }
 0x1f4   : > { %v515_v62 = vadd.f32 %v514_v59, %v513_v61 }
 0x1f6   : > { %516 = vst.msk [vmem:[%s329_s14] sm:$0xff] %vm372_vm1, %v515_v62 }
 0x1f7 PF: > { %s698_s23 = sshll.u32 %s903_s24, 3  ;;  %s530_s12 = sshll.u32 %s329_s14, 4  ;;  %s531_s12 = int_to_ptr.vmem [resolvable:$true] %s530_s12 }
 0x1f8   : > { %s528_s11 = scalar_lea.hbm %s1157_s5, %s698_s23  ;;  %s1176_s28 = sand.u32 1, %s883_s19  }
 0x1f9   : > { %s532_s16 = sshll.u32 %s528_s11, 4  ;;  %s518_s7 = scalar_lea.sflag [#allocation5], %s1176_s28  ;;  %s533_s16 = int_to_ptr.hbm [resolvable:$true] %s532_s16 }
 0x1fa   : > { %s819_s8 = sshra.s32 %s533_s16, 4  ;;  %s825_s21 = scalar_lea.hbm %s1157_s5, 16  ;;  %s820_s8 = int_to_ptr.hbm [resolvable:$true] %s819_s8 }
 0x1fb   : > { %s821_s29 = scalar_lea.hbm %s820_s8, 8  ;;  %p826_p13 = scmp.lt.s32.totalorder %s820_s8, %s1157_s5 }
 0x1fc   : > { %p822_p8 = scmp.ne.s32.totalorder %s820_s8, %s821_s29  ;;  %p827_p0 = scmp.lt.s32.totalorder %s825_s21, %s821_s29 }
 0x1fe   : > { %p823_p9 = pnand %p822_p8, %p1028_p10  ;;  %p828_p1 = por %p827_p0, %p826_p13 }
 0x200   : > { %p824_p11 = pneg %p823_p9 }
 0x202   : > { %p829_p2 = pnand %p828_p1, %p824_p11 }
 0x204   : > { %832 = shalt.err (!%p829_p2)
}
 0x205   : > { %711 = dma.vmem_to_hbm [thread:$0]  (%p1028_p10), %s531_s12, 128, %s533_s16, %s518_s7  }
 0x206 PF: > { %p717_p3 = scmp.ge.s32.totalorder %s915_s27, 2  ;;  %s544_s14 = sand.u32 1, %s879_s18  }
 0x207   : > { %s545_s17 = scalar_lea.sflag [#allocation5], %s544_s14 }
 0x208   : > { %p714_p4 = pnand %p717_p3, %p1035_p12 }
 0x20a   : > { %p715_p5 = pneg %p714_p4 }
 0x20c   : > { %874 = dma.done.wait (%p715_p5), %s545_s17, 128  }
 0x20d   : > { %876 = vsyncadd (%p715_p5), %s545_s17, 4294967168  ;;  %s18_s27 = sadd.s32 1, %s915_s27   ;;  %s1177_s22 = sld [smem:[#allocation13_spill]] }
 0x20e   : > { %p15_p6 = scmp.ge.s32.totalorder %s18_s27, 6   ;;  %s1178_s21 = sld [smem:[#allocation7_spill]] }
 0x20f   : > { %s1179_s13 = sld [smem:[#allocation12_spill]]  ;;  %s1184_s18 = smov %s883_s19 }
 0x210   : > { %s1180_s23 = sld [smem:[#allocation8_spill]]  ;;  %s1185_s19 = smov %s887_s20 }
 0x211   : > { %s1181_s24 = sld [smem:[#allocation9_spill]]  ;;  %17 = sbr.rel (!%p15_p6) target bundleno = 8 (0x8), region = 138 }
 0x212   : > { %s1182_s25 = sld [smem:[#allocation10_spill]] }
 0x213   : > { %s1183_s26 = sld [smem:[#allocation11_spill]]  ;;  %s1186_s20 = smov %s1177_s22 }
 0x215   : > { %s1187_s22 = smov %s1179_s13 }
 0x216   :  { %551 = vsyncpa [#allocation5], 1 }
 0x217   :  { %553 = vsyncpa [#allocation5 + $0x1], 1 }

</bundles_post_ra>
